<compile_context>
chip_gen: v7x
topology: tpu7x:2x2x1
jax: 0.10.0
libtpu: 0.0.40
codegen_flags: <defaults>
</compile_context>

<pallas_src>
import math

import jax
import jax.numpy as jnp
from jax import lax
from jax.experimental import pallas as pl
from jax.experimental.pallas import tpu as pltpu

_EPS = 1e-5
_VMEM_LIMIT = 32 * 1024 * 1024
_TILE_TOKENS = 512
_SCAN_CHUNK = 16


def _round_up(n, m):
    return ((n + m - 1) // m) * m


def _token_tile(n):
    return min(_TILE_TOKENS, _round_up(n, 8))


def _pad_rows(x, rows):
    if x.shape[0] == rows:
        return x
    return jnp.pad(x, ((0, rows - x.shape[0]),) + ((0, 0),) * (x.ndim - 1))


def _cparams(sem):
    return pltpu.CompilerParams(dimension_semantics=sem,
                                vmem_limit_bytes=_VMEM_LIMIT)


# --------------------------------------------------- LayerNorm + in_proj (fused)
def _ln_matmul_kernel(x_ref, g_ref, b_ref, w_ref, o_ref):
    x = x_ref[...].astype(jnp.float32)
    m = jnp.mean(x, axis=-1, keepdims=True)
    v = jnp.mean((x - m) ** 2, axis=-1, keepdims=True)
    xn = (x - m) * lax.rsqrt(v + _EPS) * g_ref[...] + b_ref[...]
    o_ref[...] = jnp.dot(xn, w_ref[...],
                         preferred_element_type=jnp.float32).astype(o_ref.dtype)


def _ln_matmul_pallas(x, g, b, w_t):
    n, cin = x.shape
    cout = w_t.shape[1]
    tile = _token_tile(n)
    np_ = _round_up(n, tile)
    out = pl.pallas_call(
        _ln_matmul_kernel,
        out_shape=jax.ShapeDtypeStruct((np_, cout), jnp.float32),
        grid_spec=pltpu.PrefetchScalarGridSpec(
            num_scalar_prefetch=0, grid=(np_ // tile,),
            in_specs=[pl.BlockSpec((tile, cin), lambda i: (i, 0)),
                      pl.BlockSpec((1, cin), lambda i: (0, 0)),
                      pl.BlockSpec((1, cin), lambda i: (0, 0)),
                      pl.BlockSpec((cin, cout), lambda i: (0, 0))],
            out_specs=pl.BlockSpec((tile, cout), lambda i: (i, 0))),
        compiler_params=_cparams(("parallel",)),
    )(_pad_rows(x, np_), g.reshape(1, cin), b.reshape(1, cin), w_t)
    return out[:n]


# ----------------------------- out_norm(y) * SiLU(z) + out_proj + residual (fused)
def _gate_out_kernel(y_ref, z_ref, g_ref, b_ref, w_ref, r_ref, o_ref):
    y = y_ref[...].astype(jnp.float32)
    z = z_ref[...].astype(jnp.float32)
    m = jnp.mean(y, axis=-1, keepdims=True)
    v = jnp.mean((y - m) ** 2, axis=-1, keepdims=True)
    yn = (y - m) * lax.rsqrt(v + _EPS) * g_ref[...] + b_ref[...]
    gated = yn * (z * (1.0 / (1.0 + jnp.exp(-z))))
    acc = jnp.dot(gated, w_ref[...], preferred_element_type=jnp.float32)
    o_ref[...] = (r_ref[...].astype(jnp.float32) + acc).astype(o_ref.dtype)


def _gate_out_pallas(y, z, g, b, w_t, res):
    n, dv = y.shape
    cout = w_t.shape[1]
    tile = _token_tile(n)
    np_ = _round_up(n, tile)
    out = pl.pallas_call(
        _gate_out_kernel,
        out_shape=jax.ShapeDtypeStruct((np_, cout), jnp.float32),
        grid_spec=pltpu.PrefetchScalarGridSpec(
            num_scalar_prefetch=0, grid=(np_ // tile,),
            in_specs=[pl.BlockSpec((tile, dv), lambda i: (i, 0)),
                      pl.BlockSpec((tile, dv), lambda i: (i, 0)),
                      pl.BlockSpec((1, dv), lambda i: (0, 0)),
                      pl.BlockSpec((1, dv), lambda i: (0, 0)),
                      pl.BlockSpec((dv, cout), lambda i: (0, 0)),
                      pl.BlockSpec((tile, cout), lambda i: (i, 0))],
            out_specs=pl.BlockSpec((tile, cout), lambda i: (i, 0))),
        compiler_params=_cparams(("parallel",)),
    )(_pad_rows(y, np_), _pad_rows(z, np_), g.reshape(1, dv), b.reshape(1, dv),
      w_t, _pad_rows(res, np_))
    return out[:n]


# --------------------------------------------- depthwise 3x3 conv + bias + SiLU
def _dwconv_silu_kernel(x_ref, w_ref, b_ref, o_ref):
    ho, wo = o_ref.shape[1], o_ref.shape[2]
    w = w_ref[...]                                      # (9, D)
    acc = jnp.zeros(o_ref.shape, jnp.float32) + b_ref[...]
    for i in range(3):
        for j in range(3):
            acc = acc + (x_ref[:, i:i + ho, j:j + wo, :]
                         * w[3 * i + j:3 * i + j + 1, :])
    o_ref[...] = (acc * (1.0 / (1.0 + jnp.exp(-acc)))).astype(o_ref.dtype)


def _dwconv_silu_pallas(x, w, b):
    bsz, h, wdt, d = x.shape
    xp = jnp.pad(x, ((0, 0), (1, 1), (1, 1), (0, 0)))
    return pl.pallas_call(
        _dwconv_silu_kernel,
        out_shape=jax.ShapeDtypeStruct((bsz, h, wdt, d), x.dtype),
        grid_spec=pltpu.PrefetchScalarGridSpec(
            num_scalar_prefetch=0, grid=(bsz,),
            in_specs=[pl.BlockSpec((1, h + 2, wdt + 2, d), lambda i: (i, 0, 0, 0)),
                      pl.BlockSpec((9, d), lambda i: (0, 0)),
                      pl.BlockSpec((1, d), lambda i: (0, 0))],
            out_specs=pl.BlockSpec((1, h, wdt, d), lambda i: (i, 0, 0, 0))),
        compiler_params=_cparams(("parallel",)),
    )(xp, w.reshape(9, d), b.reshape(1, d))


# ------------------------------------------------ x_proj + dt_proj (fused, per b,k)
def _xproj_dt_kernel(x_ref, wxdt_ref, wxbc_ref, wdt_ref, dt_ref, bc_ref):
    x = x_ref[0, 0]                                               # (L, D)
    # B/C projection on the MXU, stored directly in the (B,K,L,2N) layout.
    bc_ref[0, 0] = jnp.dot(x, wxbc_ref[0],
                           preferred_element_type=jnp.float32).astype(bc_ref.dtype)
    # dt_rank is tiny -> rank-1 VPU multiply-adds instead of a separate K~2 matmul.
    xdt = jnp.dot(x, wxdt_ref[0], preferred_element_type=jnp.float32)  # (L, R)
    wdt = wdt_ref[0]                                              # (R, Din)
    r = wdt.shape[0]
    if r <= 8:
        dt = xdt[:, 0:1] * wdt[0:1, :]
        for i in range(1, r):
            dt = dt + xdt[:, i:i + 1] * wdt[i:i + 1, :]
    else:
        dt = jnp.dot(xdt, wdt, preferred_element_type=jnp.float32)
    dt_ref[0, 0] = dt.astype(dt_ref.dtype)


def _xproj_dt_pallas(xs, wx_t, wdt_t):
    # xs: (B, K, L, D); wx_t: (K, D, R+2N); wdt_t: (K, R, D)
    bsz, k, seq_len, d = xs.shape
    c1 = wx_t.shape[-1]
    r = wdt_t.shape[1]
    n2 = c1 - r
    wx_dt = wx_t[:, :, :r]
    wx_bc = wx_t[:, :, r:]
    dts, bc = pl.pallas_call(
        _xproj_dt_kernel,
        out_shape=(jax.ShapeDtypeStruct((bsz, k, seq_len, d), jnp.float32),
                   jax.ShapeDtypeStruct((bsz, k, seq_len, n2), jnp.float32)),
        grid_spec=pltpu.PrefetchScalarGridSpec(
            num_scalar_prefetch=0, grid=(bsz, k),
            in_specs=[pl.BlockSpec((1, 1, seq_len, d), lambda b, a: (b, a, 0, 0)),
                      pl.BlockSpec((1, d, r), lambda b, a: (a, 0, 0)),
                      pl.BlockSpec((1, d, n2), lambda b, a: (a, 0, 0)),
                      pl.BlockSpec((1, r, d), lambda b, a: (a, 0, 0))],
            out_specs=(pl.BlockSpec((1, 1, seq_len, d), lambda b, a: (b, a, 0, 0)),
                       pl.BlockSpec((1, 1, seq_len, n2),
                                    lambda b, a: (b, a, 0, 0)))),
        compiler_params=_cparams(("parallel", "parallel")),
    )(xs, wx_dt, wx_bc, wdt_t)
    return dts, bc


# -------------------------------------------------------- selective scan (S6)
def _selective_scan_kernel(u_ref, dt_ref, b_ref, c_ref, a_ref, d_ref, bias_ref,
                           o_ref, h_ref):
    # grid = (batch, L-chunks).  Per invocation: one time chunk of all K
    # directions.  All time-parallel math (softplus, dt*u, exp(dt*A), D*u) is
    # hoisted out of the serial loop so the per-step dependent chain is only
    # h = decay_t * h + x_t.  The per-direction state h lives in VMEM scratch
    # and persists across chunk grid steps.
    n_dirs = u_ref.shape[1]
    chunk = u_ref.shape[2]

    @pl.when(pl.program_id(1) == 0)
    def _():
        h_ref[...] = jnp.zeros_like(h_ref)

    for kk in range(n_dirs):
        u_k = u_ref[0, kk]                                    # (Tc, D)
        dt_raw = dt_ref[0, kk] + bias_ref[kk]                 # (Tc, D)
        # softplus (delta_softplus=True in selective_scan_fn), stable form.
        dt_sp = (jnp.maximum(dt_raw, 0.0)
                 + jnp.log(1.0 + jnp.exp(-jnp.abs(dt_raw))))
        du = dt_sp * u_k                                      # (Tc, D)
        a_k = a_ref[kk]                                       # (N, D)
        decay = jnp.exp(dt_sp[:, None, :] * a_k[None, :, :])  # (Tc, N, D)
        b_cols = b_ref[0, kk].T                               # (N, Tc)
        c_cols = c_ref[0, kk].T                               # (N, Tc)
        y_skip = d_ref[kk] * u_k                              # (Tc, D)

        h = h_ref[kk]                                         # (N, D)
        for t in range(chunk):
            h = decay[t] * h + du[t:t + 1, :] * b_cols[:, t:t + 1]
            y_t = jnp.sum(h * c_cols[:, t:t + 1], axis=0, keepdims=True)
            o_ref[0, kk, t:t + 1, :] = (y_t + y_skip[t:t + 1, :]
                                        ).astype(o_ref.dtype)
        h_ref[kk] = h


def _selective_scan_pallas(us, dts, bs, cs, a_t, d_s, dt_bias):
    # us/dts: (B, K, L, Din); bs/cs: (B, K, L, N) dense rows; a_t: (K, N, Din)
    bsz, k, seq_len, d_inner = us.shape
    n_state = bs.shape[-1]
    chunk = _SCAN_CHUNK if seq_len >= _SCAN_CHUNK else _round_up(seq_len, 8)
    lp = _round_up(seq_len, chunk)
    if lp != seq_len:
        pad = ((0, 0), (0, 0), (0, lp - seq_len), (0, 0))
        us = jnp.pad(us, pad)
        dts = jnp.pad(dts, pad)
        bs = jnp.pad(bs, pad)
        cs = jnp.pad(cs, pad)
    out = pl.pallas_call(
        _selective_scan_kernel,
        out_shape=jax.ShapeDtypeStruct((bsz, k, lp, d_inner), jnp.float32),
        grid_spec=pltpu.PrefetchScalarGridSpec(
            num_scalar_prefetch=0, grid=(bsz, lp // chunk),
            in_specs=[
                pl.BlockSpec((1, k, chunk, d_inner), lambda b, c: (b, 0, c, 0)),
                pl.BlockSpec((1, k, chunk, d_inner), lambda b, c: (b, 0, c, 0)),
                pl.BlockSpec((1, k, chunk, n_state), lambda b, c: (b, 0, c, 0)),
                pl.BlockSpec((1, k, chunk, n_state), lambda b, c: (b, 0, c, 0)),
                pl.BlockSpec((k, n_state, d_inner), lambda b, c: (0, 0, 0)),
                pl.BlockSpec((k, 1, d_inner), lambda b, c: (0, 0, 0)),
                pl.BlockSpec((k, 1, d_inner), lambda b, c: (0, 0, 0)),
            ],
            out_specs=pl.BlockSpec((1, k, chunk, d_inner),
                                   lambda b, c: (b, 0, c, 0)),
            scratch_shapes=[pltpu.VMEM((k, n_state, d_inner), jnp.float32)]),
        compiler_params=_cparams(("parallel", "arbitrary")),
    )(us, dts, bs, cs, a_t,
      d_s.reshape(k, 1, d_inner), dt_bias.reshape(k, 1, d_inner))
    return out[:, :, :seq_len]


# --------------------------------------------------------------- SS2D / block
def _ss2d_core(xc, p):
    bsz, h, w, d = xc.shape
    seq_len = h * w
    n_state = p["A_logs"].shape[-1]

    # 4 scan orders: row-major, col-major and their reverses (index shuffles).
    # TODO(synk): build reversed / transposed directions inside the kernels via
    # index_map to avoid materializing this 4x duplicated stack in HBM.
    xs0 = xc.reshape(bsz, seq_len, d)
    xs1 = jnp.transpose(xc, (0, 2, 1, 3)).reshape(bsz, seq_len, d)
    xs = jnp.stack([xs0, xs1, xs0[:, ::-1], xs1[:, ::-1]], axis=1)   # (B,K,L,D)

    # x_proj + dt_proj fused, outputs already in (B,K,L,*) layout.
    dts, bc = _xproj_dt_pallas(xs, p["xproj_w_t"], p["dt_w_t"])
    bs = bc[..., :n_state]
    cs = bc[..., n_state:]

    a_t = jnp.transpose(-jnp.exp(p["A_logs"]), (0, 2, 1))            # (K,N,D)
    ys = _selective_scan_pallas(xs, dts, bs, cs, a_t, p["Ds"], p["dt_bias"])

    # Merge the 4 directional outputs back into row-major token order.
    y0 = ys[:, 0]
    y2 = ys[:, 2][:, ::-1]
    y1 = jnp.transpose(ys[:, 1].reshape(bsz, w, h, d),
                       (0, 2, 1, 3)).reshape(bsz, seq_len, d)
    y3 = jnp.transpose(ys[:, 3][:, ::-1].reshape(bsz, w, h, d),
                       (0, 2, 1, 3)).reshape(bsz, seq_len, d)
    return (y0 + y2 + y1 + y3).reshape(bsz, h, w, d)


def _vss_block(x, p):
    bsz, h, w, c = x.shape
    d_inner = p["conv_b"].shape[0]
    n_tok = bsz * h * w
    res = x.reshape(n_tok, c)

    xz = _ln_matmul_pallas(res, p["ln1_g"], p["ln1_b"], p["w_in_t"])  # LN+in_proj
    x1 = xz[:, :d_inner].reshape(bsz, h, w, d_inner)
    z = xz[:, d_inner:]
    xc = _dwconv_silu_pallas(x1, p["conv_w"], p["conv_b"])            # dwconv+SiLU
    y = _ss2d_core(xc, p).reshape(n_tok, d_inner)                     # SS2D core
    out = _gate_out_pallas(y, z, p["lnout_g"], p["lnout_b"],
                           p["w_out_t"], res)                         # gate+proj+res
    return out.reshape(bsz, h, w, c)


def vss_layer_forward(x, params):
    # VSSLayer.forward: sequential VSSBlocks; downsample=None, drop_path=0 (eval).
    for p in params["blocks"]:
        x = _vss_block(x, p)
    return x


# ------------------------------------------------------------------ parameters
def make_params(key, dim, depth, d_state=16, expand=2, d_conv=3):
    d_inner = expand * dim
    dt_rank = math.ceil(dim / 16)
    k = 4
    blocks = []
    for _ in range(depth):
        key, *ks = jax.random.split(key, 12)
        ks = iter(ks)
        blocks.append(dict(
            ln1_g=1.0 + 0.1 * jax.random.normal(next(ks), (dim,), jnp.float32),
            ln1_b=0.1 * jax.random.normal(next(ks), (dim,), jnp.float32),
            w_in_t=jax.random.normal(next(ks), (dim, 2 * d_inner),
                                     jnp.float32) / math.sqrt(dim),
            conv_w=0.2 * jax.random.normal(next(ks), (d_conv, d_conv, d_inner),
                                           jnp.float32),
            conv_b=0.1 * jax.random.normal(next(ks), (d_inner,), jnp.float32),
            xproj_w_t=jax.random.normal(next(ks),
                                        (k, d_inner, dt_rank + 2 * d_state),
                                        jnp.float32) / math.sqrt(d_inner),
            dt_w_t=0.1 * jax.random.normal(next(ks), (k, dt_rank, d_inner),
                                           jnp.float32),
            dt_bias=-4.0 + 0.5 * jax.random.normal(next(ks), (k, d_inner),
                                                   jnp.float32),
            A_logs=jnp.broadcast_to(
                jnp.log(jnp.arange(1, d_state + 1, dtype=jnp.float32)),
                (k, d_inner, d_state)),
            Ds=jnp.ones((k, d_inner), jnp.float32),
            lnout_g=1.0 + 0.1 * jax.random.normal(next(ks), (d_inner,), jnp.float32),
            lnout_b=0.1 * jax.random.normal(next(ks), (d_inner,), jnp.float32),
            w_out_t=jax.random.normal(next(ks), (d_inner, dim),
                                      jnp.float32) / math.sqrt(d_inner),
        ))
    return {"blocks": blocks}


# -------------------------------------------------------- pure-JAX reference
def _ref_ln(x, g, b):
    m = jnp.mean(x, axis=-1, keepdims=True)
    v = jnp.mean((x - m) ** 2, axis=-1, keepdims=True)
    return (x - m) * lax.rsqrt(v + _EPS) * g + b


def _ref_core(xc, p):
    bsz, h, w, d = xc.shape
    seq_len = h * w
    n_state = p["A_logs"].shape[-1]
    dt_rank = p["dt_w_t"].shape[1]
    xs0 = xc.reshape(bsz, seq_len, d)
    xs1 = jnp.transpose(xc, (0, 2, 1, 3)).reshape(bsz, seq_len, d)
    xs = jnp.stack([xs0, xs1, xs0[:, ::-1], xs1[:, ::-1]], axis=1)
    hp = jax.lax.Precision.HIGHEST
    x_dbl = jnp.einsum("bkld,kdc->bklc", xs, p["xproj_w_t"], precision=hp)
    dts = jnp.einsum("bklr,krd->bkld", x_dbl[..., :dt_rank], p["dt_w_t"],
                     precision=hp)
    bs = x_dbl[..., dt_rank:dt_rank + n_state]
    cs = x_dbl[..., dt_rank + n_state:]
    a = -jnp.exp(p["A_logs"])                                    # (K, D, N)

    def scan_one(u, dt, bseq, cseq, a_k, d_k, bias_k):
        dt = jax.nn.softplus(dt + bias_k)

        def step(hst, inp):
            u_t, dt_t, b_t, c_t = inp
            hst = (jnp.exp(dt_t[:, None] * a_k) * hst
                   + (dt_t * u_t)[:, None] * b_t[None, :])
            return hst, hst @ c_t + d_k * u_t

        h0 = jnp.zeros((u.shape[-1], a_k.shape[-1]), jnp.float32)
        _, ys = lax.scan(step, h0, (u, dt, bseq, cseq))
        return ys

    scan_k = jax.vmap(scan_one, in_axes=(0, 0, 0, 0, 0, 0, 0))
    scan_bk = jax.vmap(scan_k, in_axes=(0, 0, 0, 0, None, None, None))
    ys = scan_bk(xs, dts, bs, cs, a, p["Ds"], p["dt_bias"])      # (B,K,L,D)

    y0 = ys[:, 0]
    y2 = ys[:, 2][:, ::-1]
    y1 = jnp.transpose(ys[:, 1].reshape(bsz, w, h, d),
                       (0, 2, 1, 3)).reshape(bsz, seq_len, d)
    y3 = jnp.transpose(ys[:, 3][:, ::-1].reshape(bsz, w, h, d),
                       (0, 2, 1, 3)).reshape(bsz, seq_len, d)
    return (y0 + y2 + y1 + y3).reshape(bsz, h, w, d)


def _ref_block(x, p):
    d_inner = p["conv_b"].shape[0]
    hp = jax.lax.Precision.HIGHEST
    xn = _ref_ln(x, p["ln1_g"], p["ln1_b"])
    xz = jnp.einsum("bhwc,cd->bhwd", xn, p["w_in_t"], precision=hp)
    x1, z = xz[..., :d_inner], xz[..., d_inner:]
    kern = p["conv_w"][:, :, None, :]
    xc = lax.conv_general_dilated(
        x1, kern, window_strides=(1, 1), padding="SAME",
        dimension_numbers=("NHWC", "HWIO", "NHWC"),
        feature_group_count=d_inner) + p["conv_b"]
    xc = xc * jax.nn.sigmoid(xc)
    y = _ref_core(xc, p)
    y = _ref_ln(y, p["lnout_g"], p["lnout_b"]) * (z * jax.nn.sigmoid(z))
    return x + jnp.einsum("bhwd,dc->bhwc", y, p["w_out_t"], precision=hp)


def _ref_layer(x, params):
    for p in params["blocks"]:
        x = _ref_block(x, p)
    return x


# ----------------------------------------------------------------------- main
if __name__ == "__main__":
    B, H, W, dim, depth = 2, 8, 8, 32, 2

    key = jax.random.PRNGKey(0)
    kx, kp = jax.random.split(key)
    x = jax.random.normal(kx, (B, H, W, dim), jnp.float32)
    params = make_params(kp, dim, depth)

    out = vss_layer_forward(x, params)
    out = jax.block_until_ready(out)

    ref = _ref_layer(x, params)
    assert out.shape == (B, H, W, dim)
    rel_err = float(jnp.linalg.norm(out - ref) / (jnp.linalg.norm(ref) + 1e-12))
    assert rel_err < 2e-2, f"relative error too large: {rel_err}"

    print("KERNEL_OK")
</pallas_src>

<mosaic_0001>
module attributes {stable_mosaic.version = 11 : i64} {
  func.func @_ln_matmul_kernel(%arg0: i32, %arg1: memref<128x32xf32, #tpu.memory_space<vmem>>, %arg2: memref<1x32xf32, #tpu.memory_space<vmem>>, %arg3: memref<1x32xf32, #tpu.memory_space<vmem>>, %arg4: memref<32x128xf32, #tpu.memory_space<vmem>>, %arg5: memref<128x128xf32, #tpu.memory_space<vmem>>) attributes {dimension_semantics = [#tpu.dimension_semantics<parallel>], iteration_bounds = array<i64: 1>, scalar_prefetch = 0 : i64, scratch_operands = 0 : i64, tpu.core_type = #tpu.core_type<tc>, window_params = [{transform_indices = @transform_0, window_bounds = array<i64: 128, 32>}, {pipeline_mode = #tpu.pipeline_mode<synchronous>, transform_indices = @transform_1, window_bounds = array<i64: 1, 32>}, {pipeline_mode = #tpu.pipeline_mode<synchronous>, transform_indices = @transform_2, window_bounds = array<i64: 1, 32>}, {pipeline_mode = #tpu.pipeline_mode<synchronous>, transform_indices = @transform_3, window_bounds = array<i64: 32, 128>}, {transform_indices = @transform_4, window_bounds = array<i64: 128, 128>}]} {
    %c0 = arith.constant 0 : index
    %c0_0 = arith.constant 0 : index
    %0 = vector.load %arg1[%c0, %c0_0] : memref<128x32xf32, #tpu.memory_space<vmem>>, vector<128x32xf32>
    %cst = arith.constant dense<0.000000e+00> : vector<128xf32>
    %1 = vector.multi_reduction <add>, %0, %cst [1] : vector<128x32xf32> to vector<128xf32>
    %2 = vector.shape_cast %1 : vector<128xf32> to vector<128x1xf32>
    %cst_1 = arith.constant 3.200000e+01 : f32
    %3 = vector.broadcast %cst_1 : f32 to vector<128x1xf32>
    %4 = arith.divf %2, %3 : vector<128x1xf32>
    %5 = vector.broadcast %4 : vector<128x1xf32> to vector<128x32xf32>
    %6 = arith.subf %0, %5 : vector<128x32xf32>
    %7 = arith.mulf %6, %6 : vector<128x32xf32>
    %cst_2 = arith.constant dense<0.000000e+00> : vector<128xf32>
    %8 = vector.multi_reduction <add>, %7, %cst_2 [1] : vector<128x32xf32> to vector<128xf32>
    %9 = vector.shape_cast %8 : vector<128xf32> to vector<128x1xf32>
    %cst_3 = arith.constant 3.200000e+01 : f32
    %10 = vector.broadcast %cst_3 : f32 to vector<128x1xf32>
    %11 = arith.divf %9, %10 : vector<128x1xf32>
    %12 = vector.broadcast %4 : vector<128x1xf32> to vector<128x32xf32>
    %13 = arith.subf %0, %12 : vector<128x32xf32>
    %cst_4 = arith.constant 9.99999974E-6 : f32
    %14 = vector.broadcast %cst_4 : f32 to vector<128x1xf32>
    %15 = arith.addf %11, %14 : vector<128x1xf32>
    %16 = math.rsqrt %15 : vector<128x1xf32>
    %17 = vector.broadcast %16 : vector<128x1xf32> to vector<128x32xf32>
    %18 = arith.mulf %13, %17 : vector<128x32xf32>
    %c0_5 = arith.constant 0 : index
    %c0_6 = arith.constant 0 : index
    %19 = vector.load %arg2[%c0_5, %c0_6] : memref<1x32xf32, #tpu.memory_space<vmem>>, vector<1x32xf32>
    %20 = vector.broadcast %19 : vector<1x32xf32> to vector<128x32xf32>
    %21 = arith.mulf %18, %20 : vector<128x32xf32>
    %c0_7 = arith.constant 0 : index
    %c0_8 = arith.constant 0 : index
    %22 = vector.load %arg3[%c0_7, %c0_8] : memref<1x32xf32, #tpu.memory_space<vmem>>, vector<1x32xf32>
    %23 = vector.broadcast %22 : vector<1x32xf32> to vector<128x32xf32>
    %24 = arith.addf %21, %23 : vector<128x32xf32>
    %c0_9 = arith.constant 0 : index
    %c0_10 = arith.constant 0 : index
    %25 = vector.load %arg4[%c0_9, %c0_10] : memref<32x128xf32, #tpu.memory_space<vmem>>, vector<32x128xf32>
    %cst_11 = arith.constant dense<0.000000e+00> : vector<128x128xf32>
    %26 = tpu.matmul %24, %25, %cst_11 {dimension_numbers = #tpu.dot_dimension_numbers<[1], [0], [0], [1], [0, 0, 1, 1], [], []>} : vector<128x32xf32>, vector<32x128xf32>, vector<128x128xf32> -> vector<128x128xf32>
    %c0_12 = arith.constant 0 : index
    %c0_13 = arith.constant 0 : index
    %27 = vector.load %arg5[%c0_12, %c0_13] : memref<128x128xf32, #tpu.memory_space<vmem>>, vector<128x128xf32>
    tpu.vector_store %arg5[%c0_12, %c0_13], %26 {strides = array<i32>} : memref<128x128xf32, #tpu.memory_space<vmem>>, vector<128x128xf32>,
    return
  }
  func.func @transform_0(%arg0: i32) -> (i32, i32) {
    %c0_i32 = arith.constant 0 : i32
    %c0_i32_0 = arith.constant 0 : i32
    return %arg0, %c0_i32 : i32, i32
  }
  func.func @transform_1(%arg0: i32) -> (i32, i32) {
    %c0_i32 = arith.constant 0 : i32
    %c0_i32_0 = arith.constant 0 : i32
    %c0_i32_1 = arith.constant 0 : i32
    return %c0_i32, %c0_i32_0 : i32, i32
  }
  func.func @transform_2(%arg0: i32) -> (i32, i32) {
    %c0_i32 = arith.constant 0 : i32
    %c0_i32_0 = arith.constant 0 : i32
    %c0_i32_1 = arith.constant 0 : i32
    return %c0_i32, %c0_i32_0 : i32, i32
  }
  func.func @transform_3(%arg0: i32) -> (i32, i32) {
    %c0_i32 = arith.constant 0 : i32
    %c0_i32_0 = arith.constant 0 : i32
    %c0_i32_1 = arith.constant 0 : i32
    return %c0_i32, %c0_i32_0 : i32, i32
  }
  func.func @transform_4(%arg0: i32) -> (i32, i32) {
    %c0_i32 = arith.constant 0 : i32
    %c0_i32_0 = arith.constant 0 : i32
    return %arg0, %c0_i32 : i32, i32
  }
}

</mosaic_0001>

<bundles_post_ra>
// kernel: tpu_custom_call.1
= control target key start
LH: loop header
LB: loop body
LE: loop exit
PB: predicated region body
PF: predicated region fallthrough
CT: control target
= control target key end

     0   :  { %vm34_vm0 = vcmask 261120   ;;  %s970_s0 = inlined_call_operand.vmem [shape: f32[128,32], index: 0, kind: input, shape index: {}]   ;;  %s971_s1 = inlined_call_operand.vmem [shape: f32[1,32], index: 1, kind: input, shape index: {}]   ;;  %s972_s2 = inlined_call_operand.vmem [shape: f32[1,32], index: 2, kind: input, shape index: {}]   ;;  %s973_s3 = inlined_call_operand.vmem [shape: f32[32,128], index: 3, kind: input, shape index: {}]   ;;  %s974_s4 = inlined_call_operand.hbm [shape: f32[128,128], index: 4, kind: output, shape index: {}]  }
   0x1   :  { %v18_v0 = vld [vmem:[%s970_s0] sm:$0xff]  ;;  %v19_v1 = vld [vmem:[%s970_s0 + $0x8] sm:$0xff]  ;;  %v20_v8 = vld [vmem:[%s970_s0 + $0x10] sm:$0xff] }
   0x2   :  { %v26_v2 = vld [vmem:[%s970_s0 + $0x40] sm:$0xff]  ;;  %v35_v3 = vsel %vm34_vm0, %v18_v0, 0.0  ;;  %v38_v4 = vsel %vm34_vm0, %v19_v1, 0.0  ;;  %v27_v5 = vld [vmem:[%s970_s0 + $0x48] sm:$0xff]  ;;  %v28_v9 = vld [vmem:[%s970_s0 + $0x50] sm:$0xff] }
   0x3   :  { %36 = vadd.xlane.f32.xlu0 %v35_v3  ;;  %39 = vadd.xlane.f32.xlu1 %v38_v4  ;;  %v59_v6 = vsel %vm34_vm0, %v26_v2, 0.0  ;;  %v62_v7 = vsel %vm34_vm0, %v27_v5, 0.0 }
   0x4   :  { %9 = vsyncpa [#allocation3], 0  ;;  %v41_v10 = vsel %vm34_vm0, %v20_v8, 0.0  ;;  %v65_v11 = vsel %vm34_vm0, %v28_v9, 0.0  ;;  %v715_v12 = vld [vmem:[%s970_s0 + $0x18] sm:$0xff]  ;;  %v729_v16 = vld [vmem:[%s970_s0 + $0x20] sm:$0xff] }
   0x5   :  { %v720_v13 = vld [vmem:[%s970_s0 + $0x58] sm:$0xff]  ;;  %v44_v14 = vsel %vm34_vm0, %v715_v12, 0.0  ;;  %v734_v17 = vld [vmem:[%s970_s0 + $0x60] sm:$0xff]  ;;  %v47_v18 = vsel %vm34_vm0, %v729_v16, 0.0  ;;  %v743_v20 = vld [vmem:[%s970_s0 + $0x28] sm:$0xff] }
   0x6   :  { %v68_v15 = vsel %vm34_vm0, %v720_v13, 0.0  ;;  %v71_v19 = vsel %vm34_vm0, %v734_v17, 0.0  ;;  %v748_v21 = vld [vmem:[%s970_s0 + $0x68] sm:$0xff]  ;;  %v50_v22 = vsel %vm34_vm0, %v743_v20, 0.0  ;;  %v757_v24 = vld [vmem:[%s970_s0 + $0x30] sm:$0xff]  ;;  %v771_v28 = vld [vmem:[%s970_s0 + $0x38] sm:$0xff] }
   0x7   :  { %60 = vadd.xlane.f32.xlu0 %v59_v6  ;;  %63 = vadd.xlane.f32.xlu1 %v62_v7  ;;  %v74_v23 = vsel %vm34_vm0, %v748_v21, 0.0  ;;  %v762_v25 = vld [vmem:[%s970_s0 + $0x70] sm:$0xff]  ;;  %v53_v26 = vsel %vm34_vm0, %v757_v24, 0.0  ;;  %v776_v29 = vld [vmem:[%s970_s0 + $0x78] sm:$0xff]  ;;  %v56_v30 = vsel %vm34_vm0, %v771_v28, 0.0 }
   0x8   :  { %v77_v27 = vsel %vm34_vm0, %v762_v25, 0.0  ;;  %v80_v31 = vsel %vm34_vm0, %v776_v29, 0.0 }
   0xb   :  { %42 = vadd.xlane.f32.xlu0 %v41_v10  ;;  %66 = vadd.xlane.f32.xlu1 %v65_v11 }
   0xf   :  { %45 = vadd.xlane.f32.xlu0 %v44_v14  ;;  %69 = vadd.xlane.f32.xlu1 %v68_v15 }
  0x13   :  { %48 = vadd.xlane.f32.xlu0 %v47_v18  ;;  %72 = vadd.xlane.f32.xlu1 %v71_v19 }
  0x17   :  { %51 = vadd.xlane.f32.xlu0 %v50_v22  ;;  %75 = vadd.xlane.f32.xlu1 %v74_v23 }
  0x1b   :  { %54 = vadd.xlane.f32.xlu0 %v53_v26  ;;  %78 = vadd.xlane.f32.xlu1 %v77_v27 }
  0x1f   :  { %57 = vadd.xlane.f32.xlu0 %v56_v30  ;;  %81 = vadd.xlane.f32.xlu1 %v80_v31 }
  0x90   :  { %v37_v32 = vpop.xlane.xlu0 %36  ;;  %v40_v33 = vpop.xlane.xlu1 %39 }
  0x91   :  { %v84_v34 = vmul.f32 0.03125, %v37_v32  ;;  %v85_v35 = vmul.f32 0.03125, %v40_v33 }
  0x93   :  { %v782_v36 = vsub.f32 %v18_v0, %v84_v34  ;;  %v784_v37 = vsub.f32 %v19_v1, %v85_v35 }
  0x94   :  { %v61_v38 = vpop.xlane.xlu0 %60  ;;  %v64_v39 = vpop.xlane.xlu1 %63 }
  0x95   :  { %v92_v40 = vmul.f32 0.03125, %v61_v38  ;;  %v93_v41 = vmul.f32 0.03125, %v64_v39  ;;  %v116_v42 = vmul.f32 %v782_v36, %v782_v36  ;;  %v117_v43 = vmul.f32 %v784_v37, %v784_v37 }
  0x97   :  { %v790_v44 = vsub.f32 %v26_v2, %v92_v40  ;;  %v792_v45 = vsub.f32 %v27_v5, %v93_v41  ;;  %v132_v46 = vsel %vm34_vm0, %v116_v42, 0.0  ;;  %v135_v49 = vsel %vm34_vm0, %v117_v43, 0.0 }
  0x98   :  { %133 = vadd.xlane.f32.xlu0 %v132_v46  ;;  %v43_v47 = vpop.xlane.xlu0 %42  ;;  %v67_v48 = vpop.xlane.xlu1 %66 }
  0x99   :  { %v86_v50 = vmul.f32 0.03125, %v43_v47  ;;  %v94_v51 = vmul.f32 0.03125, %v67_v48  ;;  %v124_v52 = vmul.f32 %v790_v44, %v790_v44  ;;  %v125_v53 = vmul.f32 %v792_v45, %v792_v45 }
  0x9b   :  { %v800_v54 = vsub.f32 %v20_v8, %v86_v50  ;;  %v802_v55 = vsub.f32 %v28_v9, %v94_v51  ;;  %v156_v56 = vsel %vm34_vm0, %v124_v52, 0.0  ;;  %v159_v59 = vsel %vm34_vm0, %v125_v53, 0.0  ;;  %v291_v53 = vld [vmem:[%s973_s3 + $0x8] sm:$0xff] }
  0x9c   :  { %136 = vadd.xlane.f32.xlu0 %v135_v49  ;;  %157 = vadd.xlane.f32.xlu1 %v156_v56  ;;  %v46_v57 = vpop.xlane.xlu0 %45  ;;  %v70_v58 = vpop.xlane.xlu1 %69 }
  0x9d   :  { %v87_v60 = vmul.f32 0.03125, %v46_v57  ;;  %v95_v61 = vmul.f32 0.03125, %v70_v58  ;;  %v118_v62 = vmul.f32 %v800_v54, %v800_v54  ;;  %v126_v63 = vmul.f32 %v802_v55, %v802_v55  ;;  %v292_v57 = vld [vmem:[%s973_s3 + $0x10] sm:$0xff]  ;;  %v293_v58 = vld [vmem:[%s973_s3 + $0x18] sm:$0xff] }
  0x9f   :  { %v811_v0 = vsub.f32 %v715_v12, %v87_v60  ;;  %v814_v1 = vsub.f32 %v720_v13, %v95_v61  ;;  %v138_v2 = vsel %vm34_vm0, %v118_v62, 0.0  ;;  %v162_v5 = vsel %vm34_vm0, %v126_v63, 0.0 }
  0xa0   :  { %160 = vadd.xlane.f32.xlu1 %v159_v59  ;;  %139 = vadd.xlane.f32.xlu0 %v138_v2  ;;  %v49_v3 = vpop.xlane.xlu0 %48  ;;  %v73_v4 = vpop.xlane.xlu1 %72  ;;  %v593_v59 = vpack.c.bf16 %v293_v58, %v292_v57 }
  0xa1   :  { %v88_v6 = vmul.f32 0.03125, %v49_v3  ;;  %v96_v7 = vmul.f32 0.03125, %v73_v4  ;;  %v119_v8 = vmul.f32 %v811_v0, %v811_v0  ;;  %v127_v9 = vmul.f32 %v814_v1, %v814_v1 }
  0xa3   :  { %v823_v10 = vsub.f32 %v729_v16, %v88_v6  ;;  %v826_v11 = vsub.f32 %v734_v17, %v96_v7  ;;  %v141_v12 = vsel %vm34_vm0, %v119_v8, 0.0  ;;  %v165_v15 = vsel %vm34_vm0, %v127_v9, 0.0 }
  0xa4   :  { %163 = vadd.xlane.f32.xlu1 %v162_v5  ;;  %142 = vadd.xlane.f32.xlu0 %v141_v12  ;;  %v52_v13 = vpop.xlane.xlu0 %51  ;;  %v76_v14 = vpop.xlane.xlu1 %75 }
  0xa5   :  { %v89_v18 = vmul.f32 0.03125, %v52_v13  ;;  %v97_v19 = vmul.f32 0.03125, %v76_v14  ;;  %v120_v22 = vmul.f32 %v823_v10, %v823_v10  ;;  %v128_v16 = vmul.f32 %v826_v11, %v826_v11 }
  0xa7   :  { %v835_v23 = vsub.f32 %v743_v20, %v89_v18  ;;  %v838_v17 = vsub.f32 %v748_v21, %v97_v19  ;;  %v144_v26 = vsel %vm34_vm0, %v120_v22, 0.0  ;;  %v168_v31 = vsel %vm34_vm0, %v128_v16, 0.0 }
  0xa8   :  { %166 = vadd.xlane.f32.xlu1 %v165_v15  ;;  %145 = vadd.xlane.f32.xlu0 %v144_v26  ;;  %v55_v27 = vpop.xlane.xlu0 %54  ;;  %v79_v30 = vpop.xlane.xlu1 %78 }
  0xa9   :  { %v90_v32 = vmul.f32 0.03125, %v55_v27  ;;  %v98_v33 = vmul.f32 0.03125, %v79_v30  ;;  %v121_v34 = vmul.f32 %v835_v23, %v835_v23  ;;  %v129_v20 = vmul.f32 %v838_v17, %v838_v17  ;;  %v887_v30 = vld [vmem:[%s971_s1] ss:$0 sm:$0xff]  ;;  %s660_s1 = smov [#allocation2]  }
  0xab   :  { %v847_v35 = vsub.f32 %v757_v24, %v90_v32  ;;  %v850_v21 = vsub.f32 %v762_v25, %v98_v33  ;;  %v147_v38 = vsel %vm34_vm0, %v121_v34, 0.0  ;;  %v171_v41 = vsel %vm34_vm0, %v129_v20, 0.0 }
  0xac   :  { %169 = vadd.xlane.f32.xlu1 %v168_v31  ;;  %148 = vadd.xlane.f32.xlu0 %v147_v38  ;;  %v58_v39 = vpop.xlane.xlu0 %57  ;;  %v82_v40 = vpop.xlane.xlu1 %81  ;;  %v893_v38 = vld [vmem:[%s972_s2] ss:$0 sm:$0xff]  ;;  %s508_s2 = sshll.u32 %s660_s1, 4  ;;  %s509_s2 = int_to_ptr.vmem [resolvable:$true] %s508_s2 }
  0xad   :  { %v91_v42 = vmul.f32 0.03125, %v58_v39  ;;  %v99_v43 = vmul.f32 0.03125, %v82_v40  ;;  %v122_v46 = vmul.f32 %v847_v35, %v847_v35  ;;  %v130_v24 = vmul.f32 %v850_v21, %v850_v21  ;;  %s636_s5 = scalar_lea.vmem %s509_s2, 2048  ;;  %p641_p1 = scmp.lt.s32.totalorder %s509_s2, %s509_s2 }
  0xae   :  { %p637_p0 = scmp.ne.s32.totalorder %s509_s2, %s636_s5  ;;  %p642_p2 = scmp.lt.s32.totalorder %s636_s5, %s636_s5 }
  0xaf   :  { %v859_v47 = vsub.f32 %v771_v28, %v91_v42  ;;  %v862_v25 = vsub.f32 %v776_v29, %v99_v43  ;;  %v150_v48 = vsel %vm34_vm0, %v122_v46, 0.0  ;;  %v174_v49 = vsel %vm34_vm0, %v130_v24, 0.0  ;;  %v290_v29 = vld [vmem:[%s973_s3] sm:$0xff] }
  0xb0   :  { %172 = vadd.xlane.f32.xlu1 %v171_v41  ;;  %151 = vadd.xlane.f32.xlu0 %v150_v48  ;;  %v589_v56 = vpack.c.bf16 %v291_v53, %v290_v29  ;;  %p643_p3 = por %p642_p2, %p641_p1 }
  0xb1   :  { %v123_v50 = vmul.f32 %v859_v47, %v859_v47  ;;  %v131_v51 = vmul.f32 %v862_v25, %v862_v25 }
  0xb2   :  { %590 = vmatprep.subr.bf16.mxu0 %v589_v56  ;;  %597 = vmatprep.subr.bf16.mxu1 %v589_v56  ;;  %p644_p4 = pnand %p643_p3, %p637_p0 }
  0xb3   :  { %v153_v52 = vsel %vm34_vm0, %v123_v50, 0.0  ;;  %v177_v28 = vsel %vm34_vm0, %v131_v51, 0.0  ;;  %592 = vmatpush3.bf16.msra.mxu0 %v589_v56  ;;  %599 = vmatpush3.bf16.msra.mxu1 %v589_v56 }
  0xb4   :  { %175 = vadd.xlane.f32.xlu1 %v174_v49  ;;  %154 = vadd.xlane.f32.xlu0 %v153_v52 }
  0xb5   :  { %594 = vmatprep.subr.bf16.mxu0 %v593_v59  ;;  %598 = vmatprep.subr.bf16.mxu1 %v593_v59 }
  0xb7   :  { %596 = vmatpush3.bf16.msra.mxu0 %v593_v59  ;;  %600 = vmatpush3.bf16.msra.mxu1 %v593_v59 }
  0xb8   :  { %178 = vadd.xlane.f32.xlu1 %v177_v28 }
 0x125   :  { %v134_v60 = vpop.xlane.xlu0 %133 }
 0x126   :  { %v180_v61 = vmul.f32 0.03125, %v134_v60 }
 0x128   :  { %v196_v62 = vadd.f32 1e-05, %v180_v61 }
 0x129   :  { %v158_v63 = vpop.xlane.xlu1 %157  ;;  %v137_v2 = vpop.xlane.xlu0 %136 }
 0x12a   :  { %604 = vrsqrt.f32 %v196_v62  ;;  %v188_v3 = vmul.f32 0.03125, %v158_v63  ;;  %v181_v4 = vmul.f32 0.03125, %v137_v2 }
 0x12c   :  { %v204_v5 = vadd.f32 1e-05, %v188_v3  ;;  %v197_v6 = vadd.f32 1e-05, %v181_v4 }
 0x12d   :  { %v161_v7 = vpop.xlane.xlu1 %160  ;;  %v140_v8 = vpop.xlane.xlu0 %139 }
 0x12e   :  { %606 = vrsqrt.f32 %v204_v5  ;;  %v189_v9 = vmul.f32 0.03125, %v161_v7  ;;  %v182_v12 = vmul.f32 0.03125, %v140_v8 }
 0x12f   :  { %608 = vrsqrt.f32 %v197_v6 }
 0x130   :  { %v205_v13 = vadd.f32 1e-05, %v189_v9  ;;  %v198_v14 = vadd.f32 1e-05, %v182_v12 }
 0x131   :  { %v164_v15 = vpop.xlane.xlu1 %163  ;;  %v143_v18 = vpop.xlane.xlu0 %142 }
 0x132   :  { %610 = vrsqrt.f32 %v205_v13  ;;  %v190_v19 = vmul.f32 0.03125, %v164_v15  ;;  %v183_v22 = vmul.f32 0.03125, %v143_v18 }
 0x133   :  { %612 = vrsqrt.f32 %v198_v14 }
 0x134   :  { %v605_v16 = vpop.eup %604  ;;  %v206_v26 = vadd.f32 1e-05, %v190_v19  ;;  %v199_v27 = vadd.f32 1e-05, %v183_v22 }
 0x135   :  { %v167_v31 = vpop.xlane.xlu1 %166  ;;  %v146_v32 = vpop.xlane.xlu0 %145  ;;  %v228_v33 = vmul.f32 %v605_v16, %v782_v36 }
 0x136   :  { %614 = vrsqrt.f32 %v206_v26  ;;  %v191_v34 = vmul.f32 0.03125, %v167_v31  ;;  %v184_v20 = vmul.f32 0.03125, %v146_v32 }
 0x137   :  { %616 = vrsqrt.f32 %v199_v27  ;;  %v251_v39 = vmul.f32 %v887_v30, %v228_v33 }
 0x138   :  { %v607_v40 = vpop.eup %606  ;;  %v207_v41 = vadd.f32 1e-05, %v191_v34  ;;  %v200_v42 = vadd.f32 1e-05, %v184_v20 }
 0x139   :  { %v609_v43 = vpop.eup %608  ;;  %v170_v46 = vpop.xlane.xlu1 %169  ;;  %v274_v48 = vadd.f32 %v893_v38, %v251_v39  ;;  %v236_v36 = vmul.f32 %v607_v40, %v790_v44 }
 0x13a   :  { %v149_v24 = vpop.xlane.xlu0 %148  ;;  %618 = vrsqrt.f32 %v207_v41  ;;  %v192_v49 = vmul.f32 0.03125, %v170_v46  ;;  %v229_v51 = vmul.f32 %v609_v43, %v784_v37 }
 0x13b   :  { %v185_v50 = vmul.f32 0.03125, %v149_v24  ;;  %620 = vrsqrt.f32 %v200_v42  ;;  %565 = vmatprep.mubr.msk.f32.mxu0 %vm34_vm0, %v274_v48  ;;  %v259_v52 = vmul.f32 %v887_v30, %v236_v36 }
 0x13c   :  { %v611_v28 = vpop.eup %610  ;;  %v208_v29 = vadd.f32 1e-05, %v192_v49  ;;  %v252_v56 = vmul.f32 %v887_v30, %v229_v51 }
 0x13d   :  { %v201_v53 = vadd.f32 1e-05, %v185_v50  ;;  %v613_v57 = vpop.eup %612  ;;  %v173_v58 = vpop.xlane.xlu1 %172  ;;  %v282_v44 = vadd.f32 %v893_v38, %v259_v52  ;;  %v237_v60 = vmul.f32 %v611_v28, %v792_v45 }
 0x13e   :  { %v152_v59 = vpop.xlane.xlu0 %151  ;;  %622 = vrsqrt.f32 %v208_v29  ;;  %v193_v61 = vmul.f32 0.03125, %v173_v58  ;;  %v275_v62 = vadd.f32 %v893_v38, %v252_v56  ;;  %v230_v63 = vmul.f32 %v613_v57, %v800_v54 }
 0x13f   :  { %v186_v37 = vmul.f32 0.03125, %v152_v59  ;;  %624 = vrsqrt.f32 %v201_v53  ;;  %577 = vmatprep.mubr.msk.f32.mxu1 %vm34_vm0, %v282_v44  ;;  %v260_v2 = vmul.f32 %v887_v30, %v237_v60 }
 0x140   :  { %v615_v3 = vpop.eup %614  ;;  %v209_v4 = vadd.f32 1e-05, %v193_v61  ;;  %566 = vmatmul.mubr.msk.f32.vlgmr.msra.gmra.mrb[0].mxu0 %vm34_vm0, %v275_v62  ;;  %v253_v8 = vmul.f32 %v887_v30, %v230_v63 }
 0x141   :  { %v202_v5 = vadd.f32 1e-05, %v186_v37  ;;  %v617_v6 = vpop.eup %616  ;;  %v176_v7 = vpop.xlane.xlu1 %175  ;;  %v283_v9 = vadd.f32 %v893_v38, %v260_v2  ;;  %v238_v12 = vmul.f32 %v615_v3, %v802_v55 }
 0x142   :  { %v155_v45 = vpop.xlane.xlu0 %154  ;;  %626 = vrsqrt.f32 %v209_v4  ;;  %v194_v13 = vmul.f32 0.03125, %v176_v7  ;;  %v231_v54 = vmul.f32 %v617_v6, %v811_v0  ;;  %v276_v15 = vadd.f32 %v893_v38, %v253_v8 }
 0x143   :  { %v187_v14 = vmul.f32 0.03125, %v155_v45  ;;  %628 = vrsqrt.f32 %v202_v5  ;;  %578 = vmatmul.mubr.msk.f32.vlgmr.msra.gmra.mrb[0].mxu1 %vm34_vm0, %v283_v9  ;;  %v261_v18 = vmul.f32 %v887_v30, %v238_v12 }
 0x144   :  { %v619_v19 = vpop.eup %618  ;;  %v210_v22 = vadd.f32 1e-05, %v194_v13  ;;  %v254_v26 = vmul.f32 %v887_v30, %v231_v54  ;;  %568 = vmatprep.mubr.msk.f32.mxu0 %vm34_vm0, %v276_v15 }
 0x145   :  { %v203_v16 = vadd.f32 1e-05, %v187_v14  ;;  %v621_v27 = vpop.eup %620  ;;  %v179_v55 = vpop.xlane.xlu1 %178  ;;  %v284_v31 = vadd.f32 %v893_v38, %v261_v18  ;;  %v239_v0 = vmul.f32 %v619_v19, %v814_v1 }
 0x146   :  { %630 = vrsqrt.f32 %v210_v22  ;;  %v195_v32 = vmul.f32 0.03125, %v179_v55  ;;  %v277_v33 = vadd.f32 %v893_v38, %v254_v26  ;;  %v232_v34 = vmul.f32 %v621_v27, %v823_v10 }
 0x147   :  { %632 = vrsqrt.f32 %v203_v16  ;;  %580 = vmatprep.mubr.msk.f32.mxu1 %vm34_vm0, %v284_v31  ;;  %v262_v20 = vmul.f32 %v887_v30, %v239_v0 }
 0x148   :  { %v623_v39 = vpop.eup %622  ;;  %v211_v40 = vadd.f32 1e-05, %v195_v32  ;;  %569 = vmatmul.mubr.msk.f32.gmra.mrb[2].mxu0 %vm34_vm0, %v277_v33  ;;  %v255_v41 = vmul.f32 %v887_v30, %v232_v34 }
 0x149   :  { %v625_v42 = vpop.eup %624  ;;  %v285_v1 = vadd.f32 %v893_v38, %v262_v20  ;;  %v240_v43 = vmul.f32 %v623_v39, %v826_v11 }
 0x14a   :  { %634 = vrsqrt.f32 %v211_v40  ;;  %v278_v46 = vadd.f32 %v893_v38, %v255_v41  ;;  %v233_v10 = vmul.f32 %v625_v42, %v835_v23 }
 0x14b   :  { %581 = vmatmul.mubr.msk.f32.gmra.mrb[2].mxu1 %vm34_vm0, %v285_v1  ;;  %v263_v24 = vmul.f32 %v887_v30, %v240_v43 }
 0x14c   :  { %v627_v48 = vpop.eup %626  ;;  %571 = vmatprep.mubr.msk.f32.mxu0 %vm34_vm0, %v278_v46  ;;  %v256_v36 = vmul.f32 %v887_v30, %v233_v10 }
 0x14d   :  { %v629_v49 = vpop.eup %628  ;;  %v286_v50 = vadd.f32 %v893_v38, %v263_v24  ;;  %v241_v51 = vmul.f32 %v627_v48, %v838_v17 }
 0x14e   :  { %v279_v11 = vadd.f32 %v893_v38, %v256_v36  ;;  %v234_v52 = vmul.f32 %v629_v49, %v847_v35 }
 0x14f   :  { %583 = vmatprep.mubr.msk.f32.mxu1 %vm34_vm0, %v286_v50  ;;  %v264_v23 = vmul.f32 %v887_v30, %v241_v51 }
 0x150   :  { %v631_v28 = vpop.eup %630  ;;  %572 = vmatmul.mubr.msk.f32.gmra.mrb[4].mxu0 %vm34_vm0, %v279_v11  ;;  %v257_v29 = vmul.f32 %v887_v30, %v234_v52 }
 0x151   :  { %v633_v53 = vpop.eup %632  ;;  %v287_v56 = vadd.f32 %v893_v38, %v264_v23  ;;  %v242_v57 = vmul.f32 %v631_v28, %v850_v21 }
 0x152   :  { %v280_v17 = vadd.f32 %v893_v38, %v257_v29  ;;  %v235_v58 = vmul.f32 %v633_v53, %v859_v47 }
 0x153   :  { %584 = vmatmul.mubr.msk.f32.gmra.mrb[4].mxu1 %vm34_vm0, %v287_v56  ;;  %v265_v35 = vmul.f32 %v887_v30, %v242_v57 }
 0x154   :  { %v635_v59 = vpop.eup %634  ;;  %574 = vmatprep.mubr.msk.f32.mxu0 %vm34_vm0, %v280_v17  ;;  %v258_v44 = vmul.f32 %v887_v30, %v235_v58 }
 0x155   :  { %v288_v60 = vadd.f32 %v893_v38, %v265_v35  ;;  %v243_v61 = vmul.f32 %v635_v59, %v862_v25 }
 0x156   :  { %v281_v37 = vadd.f32 %v893_v38, %v258_v44 }
 0x157   :  { %586 = vmatprep.mubr.msk.f32.mxu1 %vm34_vm0, %v288_v60  ;;  %v266_v21 = vmul.f32 %v887_v30, %v243_v61 }
 0x158   :  { %575 = vmatmul.mubr.msk.f32.gmra.mrb[6].mxu0 %vm34_vm0, %v281_v37 }
 0x159   :  { %v289_v47 = vadd.f32 %v893_v38, %v266_v21 }
 0x15b   :  { %587 = vmatmul.mubr.msk.f32.gmra.mrb[6].mxu1 %vm34_vm0, %v289_v47 }
 0x213   :  { %v567_v62 = vpop.f32.mrb[0].mxu0 }
 0x214   :  { %488 = vst [vmem:[#allocation2 + $0x8] sm:$0xff] %v567_v62  ;;  %v408_v63 = vpop.f32.mrb[1].mxu0 }
 0x215   :  { %487 = vst [vmem:[#allocation2] sm:$0xff] %v408_v63 }
 0x216   :  { %v579_v2 = vpop.f32.mrb[0].mxu1 }
 0x217   :  { %496 = vst [vmem:[#allocation2 + $0x48] sm:$0xff] %v579_v2  ;;  %v448_v3 = vpop.f32.mrb[1].mxu1 }
 0x218   :  { %495 = vst [vmem:[#allocation2 + $0x40] sm:$0xff] %v448_v3 }
 0x21b   :  { %v570_v25 = vpop.f32.mrb[2].mxu0 }
 0x21c   :  { %490 = vst [vmem:[#allocation2 + $0x18] sm:$0xff] %v570_v25  ;;  %v418_v4 = vpop.f32.mrb[3].mxu0 }
 0x21d   :  { %489 = vst [vmem:[#allocation2 + $0x10] sm:$0xff] %v418_v4 }
 0x21e   :  { %v582_v5 = vpop.f32.mrb[2].mxu1 }
 0x21f   :  { %498 = vst [vmem:[#allocation2 + $0x58] sm:$0xff] %v582_v5  ;;  %v458_v30 = vpop.f32.mrb[3].mxu1 }
 0x220   :  { %497 = vst [vmem:[#allocation2 + $0x50] sm:$0xff] %v458_v30 }
 0x223   :  { %v573_v6 = vpop.f32.mrb[4].mxu0 }
 0x224   :  { %492 = vst [vmem:[#allocation2 + $0x28] sm:$0xff] %v573_v6  ;;  %v428_v38 = vpop.f32.mrb[5].mxu0 }
 0x225   :  { %491 = vst [vmem:[#allocation2 + $0x20] sm:$0xff] %v428_v38 }
 0x226   :  { %v585_v7 = vpop.f32.mrb[4].mxu1 }
 0x227   :  { %500 = vst [vmem:[#allocation2 + $0x68] sm:$0xff] %v585_v7  ;;  %v468_v45 = vpop.f32.mrb[5].mxu1 }
 0x228   :  { %499 = vst [vmem:[#allocation2 + $0x60] sm:$0xff] %v468_v45 }
 0x22b   :  { %v576_v8 = vpop.f32.mrb[6].mxu0 }
 0x22c   :  { %494 = vst [vmem:[#allocation2 + $0x38] sm:$0xff] %v576_v8  ;;  %v438_v9 = vpop.f32.mrb[7].mxu0 }
 0x22d   :  { %493 = vst [vmem:[#allocation2 + $0x30] sm:$0xff] %v438_v9 }
 0x22e   :  { %v588_v12 = vpop.f32.mrb[6].mxu1 }
 0x22f   :  { %502 = vst [vmem:[#allocation2 + $0x78] sm:$0xff] %v588_v12  ;;  %v478_v13 = vpop.f32.mrb[7].mxu1 }
 0x230   :  { %501 = vst [vmem:[#allocation2 + $0x70] sm:$0xff] %v478_v13 }
 0x231   :  { %647 = shalt.err (!%p644_p4)
}
 0x232   :  { %s648_s8 = scalar_lea.hbm %s974_s4, 2048 }
 0x233   :  { %p649_p5 = scmp.ne.s32.totalorder %s974_s4, %s648_s8  ;;  %p652_p6 = scmp.lt.u32.totalorder %s648_s8, %s974_s4 }
 0x235   :  { %p654_p7 = pnand %p652_p6, %p649_p5 }
 0x237   :  { %657 = shalt.err (!%p654_p7)
}
 0x238   :  { %s661_s13 = smov 128   ;;  %s662_s14 = smov 8  }
 0x239   :  { %514 = dma.vmem_to_hbm [thread:$0]  %s509_s2, 2048, %s974_s4, [#allocation3], %s661_s13, %s661_s13, %s662_s14  }
 0x23a   :  { %658 = dma.done.wait [#allocation3], 2048  }
 0x23b   :  { %659 = vsyncadd [#allocation3], 4294965248 }
 0x23c   :  { %518 = vsyncpa [#allocation3], 1 }

</bundles_post_ra>
